<compile_context>
chip_gen: v6e
topology: v6e:2x2x1
jax: 0.10.0
libtpu: 0.0.40
codegen_flags: <defaults>
</compile_context>

<pallas_src>
import math
import numpy as np

import jax
import jax.numpy as jnp
from jax.experimental import pallas as pl
from jax.experimental.pallas import tpu as pltpu


_EPS_LN = 1e-5
_VMEM_LIMIT = 32 * 1024 * 1024   # explicit scoped-VMEM budget (safe on v5e/v6e/v7x)


def _cparams():
    return pltpu.CompilerParams(dimension_semantics=("parallel",),
                                vmem_limit_bytes=_VMEM_LIMIT)


# ----------------------------------------------------------------------------
# In-kernel helpers (traced inside pallas kernels)
# ----------------------------------------------------------------------------

def _layer_norm_f32(x, g, b, eps=_EPS_LN):
    """Channel LayerNorm over the last (lane) dim.  x:[T,C] f32, g/b:[1,C]."""
    mean = jnp.mean(x, axis=-1, keepdims=True)
    var = jnp.mean(jnp.square(x - mean), axis=-1, keepdims=True)
    return (x - mean) * jax.lax.rsqrt(var + eps) * g + b


def _conv3_same(h, w_ref):
    """Same-padded k=3 / dilation=1 conv along rows of h (in-register im2col).
    h: [T, Cin] f32 value; w_ref: Ref[3, Cin, Cout] bf16.
    The shifted taps are built by concatenating a zero row (sublane shift in
    VMEM/vregs, no HBM copies); each tap is a bf16 MXU matmul, f32 accumulate."""
    zero = jnp.zeros((1, h.shape[1]), h.dtype)
    h_lft = jnp.concatenate([zero, h[:-1, :]], axis=0)    # x[t-1] -> W[0]
    h_rgt = jnp.concatenate([h[1:, :], zero], axis=0)     # x[t+1] -> W[2]
    acc = jnp.dot(h.astype(jnp.bfloat16), w_ref[1],
                  preferred_element_type=jnp.float32)
    acc = acc + jnp.dot(h_lft.astype(jnp.bfloat16), w_ref[0],
                        preferred_element_type=jnp.float32)
    acc = acc + jnp.dot(h_rgt.astype(jnp.bfloat16), w_ref[2],
                        preferred_element_type=jnp.float32)
    return acc


# ----------------------------------------------------------------------------
# Fused Pallas kernels
# ----------------------------------------------------------------------------

def res_sublayer(x, nonpadding, ln_g, ln_b, w1, b1, w2, b2, *, scale):
    """One fused ResidualBlock sub-layer:
       out = (x + (swish(((conv3(LN(x)) + b1) * k^-0.5)) @ w2 + b2)) * nonpadding
    x:[B,T,C] f32, nonpadding:[B,T,1] f32, w1:[3,C,Cm] bf16, w2:[Cm,C] bf16."""
    B, T, C = x.shape
    Cm = w1.shape[2]

    def kernel(x_ref, np_ref, g_ref, be_ref, w1_ref, b1_ref, w2_ref, b2_ref, o_ref):
        xv = x_ref[0]                                             # [T, C]
        h = _layer_norm_f32(xv, g_ref[...], be_ref[...])
        h = (_conv3_same(h, w1_ref) + b1_ref[...]) * scale        # conv(k=3) * k^-0.5
        h = h * jax.nn.sigmoid(h)                                 # swish (f32 EUP)
        h = jnp.dot(h.astype(jnp.bfloat16), w2_ref[...],
                    preferred_element_type=jnp.float32) + b2_ref[...]
        o_ref[0] = (xv + h) * np_ref[0]

    return pl.pallas_call(
        kernel,
        out_shape=jax.ShapeDtypeStruct((B, T, C), jnp.float32),
        grid=(B,),
        in_specs=[
            pl.BlockSpec((1, T, C), lambda b: (b, 0, 0)),
            pl.BlockSpec((1, T, 1), lambda b: (b, 0, 0)),
            pl.BlockSpec((1, C), lambda b: (0, 0)),
            pl.BlockSpec((1, C), lambda b: (0, 0)),
            pl.BlockSpec((3, C, Cm), lambda b: (0, 0, 0)),
            pl.BlockSpec((1, Cm), lambda b: (0, 0)),
            pl.BlockSpec((Cm, C), lambda b: (0, 0)),
            pl.BlockSpec((1, C), lambda b: (0, 0)),
        ],
        out_specs=pl.BlockSpec((1, T, C), lambda b: (b, 0, 0)),
        compiler_params=_cparams(),
    )(x, nonpadding, ln_g.reshape(1, C), ln_b.reshape(1, C),
      w1, b1.reshape(1, Cm), w2, b2.reshape(1, C))


def ln_postconv(x, nonpadding, ln_g, ln_b, w, b, head=None):
    """ConvBlocks tail: y = conv3(LN(x*np)*np, w) + b.
    When `head=(hw, hb, inv_temp)` is given, the tech_out linear and the
    1/temperature scale are fused into the same kernel (no extra pallas_call)."""
    B, T, C = x.shape
    Cout = w.shape[2]
    base_in = (x, nonpadding, ln_g.reshape(1, C), ln_b.reshape(1, C), w,
               b.reshape(1, Cout))
    base_specs = [
        pl.BlockSpec((1, T, C), lambda bb: (bb, 0, 0)),
        pl.BlockSpec((1, T, 1), lambda bb: (bb, 0, 0)),
        pl.BlockSpec((1, C), lambda bb: (0, 0)),
        pl.BlockSpec((1, C), lambda bb: (0, 0)),
        pl.BlockSpec((3, C, Cout), lambda bb: (0, 0, 0)),
        pl.BlockSpec((1, Cout), lambda bb: (0, 0)),
    ]

    if head is None:
        def kernel(x_ref, np_ref, g_ref, be_ref, w_ref, b_ref, o_ref):
            npad = np_ref[0]
            h = x_ref[0] * npad
            h = _layer_norm_f32(h, g_ref[...], be_ref[...]) * npad
            o_ref[0] = _conv3_same(h, w_ref) + b_ref[...]
        out_c = Cout
        extra_in, extra_specs = (), []
    else:
        hw, hb, inv_temp = head                       # hw:[Cout,N] bf16, hb:[N] f32
        N = hw.shape[1]

        def kernel(x_ref, np_ref, g_ref, be_ref, w_ref, b_ref,
                   hw_ref, hb_ref, o_ref):
            npad = np_ref[0]
            h = x_ref[0] * npad
            h = _layer_norm_f32(h, g_ref[...], be_ref[...]) * npad
            y = _conv3_same(h, w_ref) + b_ref[...]
            logits = jnp.dot(y.astype(jnp.bfloat16), hw_ref[...],
                             preferred_element_type=jnp.float32) + hb_ref[...]
            o_ref[0] = logits * inv_temp
        out_c = N
        extra_in = (hw, hb.reshape(1, N))
        extra_specs = [pl.BlockSpec((Cout, N), lambda bb: (0, 0)),
                       pl.BlockSpec((1, N), lambda bb: (0, 0))]

    return pl.pallas_call(
        kernel,
        out_shape=jax.ShapeDtypeStruct((B, T, out_c), jnp.float32),
        grid=(B,),
        in_specs=base_specs + extra_specs,
        out_specs=pl.BlockSpec((1, T, out_c), lambda bb: (bb, 0, 0)),
        compiler_params=_cparams(),
    )(*(base_in + extra_in))


def conv1d_k3(x, w, b):
    """Plain same-padded k=3 Conv1d (mel_proj).  x:[B,T,Cin] f32, w:[3,Cin,Cout] bf16."""
    B, T, Cin = x.shape
    Cout = w.shape[2]

    def kernel(x_ref, w_ref, b_ref, o_ref):
        o_ref[0] = _conv3_same(x_ref[0], w_ref) + b_ref[...]

    return pl.pallas_call(
        kernel,
        out_shape=jax.ShapeDtypeStruct((B, T, Cout), jnp.float32),
        grid=(B,),
        in_specs=[pl.BlockSpec((1, T, Cin), lambda bb: (bb, 0, 0)),
                  pl.BlockSpec((3, Cin, Cout), lambda bb: (0, 0, 0)),
                  pl.BlockSpec((1, Cout), lambda bb: (0, 0))],
        out_specs=pl.BlockSpec((1, T, Cout), lambda bb: (bb, 0, 0)),
        compiler_params=_cparams(),
    )(x, w, b.reshape(1, Cout))


def down_conv_k3(x, w, b, rate):
    """Strided (stride == rate >= 2) same-padded k=3 Conv1d for the Unet down path.
    A zero-copy wrapper reshape groups `rate` consecutive frames on the lane axis,
    so the kernel reads each input frame exactly once and evaluates the 3 taps
    (x[rt-1], x[rt], x[rt+1]) as lane slices + one in-register sublane shift."""
    B, T, Cin = x.shape
    Cout = w.shape[2]
    assert rate >= 2 and T % rate == 0
    Tg = T // rate
    xg = x.reshape(B, Tg, rate * Cin)                 # zero-copy reshape

    def kernel(x_ref, w_ref, b_ref, o_ref):
        xv = x_ref[0]                                 # [Tg, rate*Cin] f32
        ctr = xv[:, 0:Cin]                            # x[r*t]     -> W[1]
        rgt = xv[:, Cin:2 * Cin]                      # x[r*t + 1] -> W[2]
        last = xv[:, (rate - 1) * Cin:rate * Cin]     # x[r*t + r - 1]
        lft = jnp.concatenate(                        # x[r*t - 1] -> W[0]
            [jnp.zeros((1, Cin), xv.dtype), last[:-1, :]], axis=0)
        acc = jnp.dot(ctr.astype(jnp.bfloat16), w_ref[1],
                      preferred_element_type=jnp.float32)
        acc = acc + jnp.dot(rgt.astype(jnp.bfloat16), w_ref[2],
                            preferred_element_type=jnp.float32)
        acc = acc + jnp.dot(lft.astype(jnp.bfloat16), w_ref[0],
                            preferred_element_type=jnp.float32)
        o_ref[0] = acc + b_ref[...]

    return pl.pallas_call(
        kernel,
        out_shape=jax.ShapeDtypeStruct((B, Tg, Cout), jnp.float32),
        grid=(B,),
        in_specs=[pl.BlockSpec((1, Tg, rate * Cin), lambda bb: (bb, 0, 0)),
                  pl.BlockSpec((3, Cin, Cout), lambda bb: (0, 0, 0)),
                  pl.BlockSpec((1, Cout), lambda bb: (0, 0))],
        out_specs=pl.BlockSpec((1, Tg, Cout), lambda bb: (bb, 0, 0)),
        compiler_params=_cparams(),
    )(xg, w, b.reshape(1, Cout))


def up_convt_skip(h, skip, w, b, rate, skip_scale):
    """Fused (h + skip_scale*skip) -> ConvTranspose1d with kernel==stride==rate
    (a per-frame matmul).  w:[Cin, rate, Cout] bf16."""
    B, T, Cin = h.shape
    Cout = w.shape[2]
    wf = w.reshape(Cin, rate * Cout)
    bt = jnp.tile(b, (rate,)).reshape(1, rate * Cout)

    def kernel(h_ref, s_ref, w_ref, b_ref, o_ref):
        z = (h_ref[0] + skip_scale * s_ref[0]).astype(jnp.bfloat16)
        o_ref[0] = jnp.dot(z, w_ref[...],
                           preferred_element_type=jnp.float32) + b_ref[...]

    y = pl.pallas_call(
        kernel,
        out_shape=jax.ShapeDtypeStruct((B, T, rate * Cout), jnp.float32),
        grid=(B,),
        in_specs=[pl.BlockSpec((1, T, Cin), lambda bb: (bb, 0, 0)),
                  pl.BlockSpec((1, T, Cin), lambda bb: (bb, 0, 0)),
                  pl.BlockSpec((Cin, rate * Cout), lambda bb: (0, 0)),
                  pl.BlockSpec((1, rate * Cout), lambda bb: (0, 0))],
        out_specs=pl.BlockSpec((1, T, rate * Cout), lambda bb: (bb, 0, 0)),
        compiler_params=_cparams(),
    )(h, skip, wf, bt)
    # zero-copy: frame t's [rate*Cout] row becomes output rows r*t .. r*t+r-1
    return y.reshape(B, T * rate, Cout)


def attn_aggregate(feat, mel2ph, wa_t, ba, P):
    """Per-batch fused: attn = mean_h sigmoid(feat . wa_h + ba_h) on the VPU
    (broadcast-mul + lane reduce, no tiny-N MXU matmul); attn_feat = feat*attn;
    scatter_add of frames into P phoneme slots via a bf16 one-hot MXU matmul and
    normalization by the aggregated attention weight.
    feat:[B,T,H] f32, mel2ph:[B,T] int, wa_t:[nh,H] f32 -> [B,P,H] f32.
    P must be padded (multiple of 8) by the caller to avoid per-length recompiles."""
    B, T, H = feat.shape
    nh = wa_t.shape[0]
    m3 = mel2ph.astype(jnp.int32)[:, None, :]           # [B,1,T]

    def kernel(m_ref, f_ref, wa_ref, ba_ref, o_ref):
        fb = f_ref[0]                                    # [T, H] f32
        wa = wa_ref[...]                                 # [nh, H]
        bv = ba_ref[...]                                 # [nh, 1]
        attn_sum = jnp.zeros((T, 1), jnp.float32)
        for hh in range(nh):                             # nh is tiny (typically 1)
            s = jnp.sum(fb * wa[hh:hh + 1, :], axis=-1, keepdims=True) + bv[hh:hh + 1, :]
            attn_sum = attn_sum + jax.nn.sigmoid(s)
        attn_mean = attn_sum * (1.0 / nh)                # [T, 1]
        attn_feat = fb * attn_mean                       # [T, H]
        oh = (jax.lax.broadcasted_iota(jnp.int32, (P, T), 0)
              == m_ref[0]).astype(jnp.bfloat16)          # [P, T] one-hot (exact in bf16)
        agg = jnp.dot(oh, attn_feat.astype(jnp.bfloat16),
                      preferred_element_type=jnp.float32)        # [P, H]
        den = jnp.dot(oh, attn_mean.astype(jnp.bfloat16),
                      preferred_element_type=jnp.float32)        # [P, 1]
        o_ref[0] = agg / (den + 1e-5)

    # TODO(synk): for very long T add an 'arbitrary' T-tile grid axis with VMEM
    # accumulators; speech-scale T fits comfortably as a single block.
    return pl.pallas_call(
        kernel,
        out_shape=jax.ShapeDtypeStruct((B, P, H), jnp.float32),
        grid=(B,),
        in_specs=[pl.BlockSpec((1, 1, T), lambda bb: (bb, 0, 0)),
                  pl.BlockSpec((1, T, H), lambda bb: (bb, 0, 0)),
                  pl.BlockSpec((nh, H), lambda bb: (0, 0)),
                  pl.BlockSpec((nh, 1), lambda bb: (0, 0))],
        out_specs=pl.BlockSpec((1, P, H), lambda bb: (bb, 0, 0)),
        compiler_params=_cparams(),
    )(m3, feat, wa_t, ba.reshape(nh, 1))


# ----------------------------------------------------------------------------
# Module forwards (composition of the fused kernels)
# ----------------------------------------------------------------------------

def conv_blocks_fwd(x, p, head=None):
    """NATSpeech-style ConvBlocks: residual sub-layers then mask->LN->mask->post conv.
    `head` optionally fuses the tech_out linear (+1/temperature) into the tail kernel."""
    scale = p["kernel_size"] ** -0.5
    nonpadding = (jnp.sum(jnp.abs(x), axis=-1, keepdims=True) > 0).astype(jnp.float32)
    for rb in p["res_blocks"]:
        for sub in rb["subs"]:
            x = res_sublayer(x, nonpadding, sub["ln_g"], sub["ln_b"],
                             sub["w1"], sub["b1"], sub["w2"], sub["b2"], scale=scale)
    return ln_postconv(x, nonpadding, p["ln_g"], p["ln_b"],
                       p["post_w"], p["post_b"], head=head)


def unet_fwd(x, p):
    skips, h = [], x
    for d in p["down"]:
        h = down_conv_k3(h, d["conv"]["w"], d["conv"]["b"], d["rate"])
        h = conv_blocks_fwd(h, d["cb"])
        skips.append(h)
    h = conv_blocks_fwd(h, p["mid"])
    for u in p["up"]:
        h = up_convt_skip(h, skips.pop(), u["convt"]["w"], u["convt"]["b"],
                          u["rate"], p["skip_scale"])
        h = conv_blocks_fwd(h, u["cb"])
    return h


def tech_extractor_forward(params, cfg, mel, ph_bd, pitch, uv, ph_length):
    # mel_proj (Conv1d k=3) + mel_encoder
    mel_embed = conv1d_k3(mel, params["mel_proj"]["w"], params["mel_proj"]["b"])
    mel_embed = conv_blocks_fwd(mel_embed, params["mel_encoder"])

    # TODO(synk): pitch/uv embedding gathers stay as XLA glue (padding_idx 0 rows
    # are zero); variance_embed == 0 (use_breathiness/use_energy/use_zcr False).
    pitch_embed = (jnp.take(params["pitch_embed"], pitch, axis=0)
                   + jnp.take(params["uv_embed"], uv, axis=0))

    feat = conv_blocks_fwd(mel_embed + pitch_embed, params["cond_encoder"])
    feat = unet_fwd(feat, params["unet"])

    # frame -> phoneme aggregation.  ph_length is data dependent (torch .item());
    # bucket it to a multiple of 8 so Mosaic does not recompile per utterance
    # and the [P, *] tiles stay sublane-aligned.  Padded phoneme rows aggregate
    # to exactly zero and are sliced off at the end.
    mel2ph = jnp.cumsum(ph_bd.astype(jnp.int32), axis=1)
    p_pad = ((int(ph_length) + 7) // 8) * 8
    ph_agg = attn_aggregate(feat, mel2ph, params["attn_w_t"], params["attn_b"], p_pad)

    # post conv blocks with tech_out + 1/temperature fused into the tail kernel.
    inv_temp = 1.0 / max(1e-7, cfg["tech_temperature"])
    logits = conv_blocks_fwd(
        ph_agg, params["post"],
        head=(params["out_w"], params["out_b"], inv_temp))
    logits = logits[:, :int(ph_length)]
    pred = (jax.nn.sigmoid(logits) > cfg["tech_threshold"]).astype(jnp.int32)
    return {"tech_logits": logits, "tech_pred": pred}


# ----------------------------------------------------------------------------
# Deterministic parameter initialization
# ----------------------------------------------------------------------------

class KeyGen:
    def __init__(self, key):
        self.key = key

    def __call__(self):
        self.key, sub = jax.random.split(self.key)
        return sub


def _kaiming(key, shape, fan_in, dtype=jnp.float32):
    w = jax.random.normal(key, shape, jnp.float32) * math.sqrt(2.0 / fan_in)
    return w.astype(dtype)


def init_conv_blocks(kg, cin, cout, *, num_layers, layers_in_block,
                     kernel_size=3, post_kernel=3, c_multiple=1):
    assert kernel_size == 3 and post_kernel == 3  # only k=3 / dilation=1 used here
    res_blocks = []
    for _ in range(num_layers):
        subs = []
        for _ in range(layers_in_block):
            cm = c_multiple * cin
            subs.append({
                "ln_g": jnp.ones((cin,), jnp.float32),
                "ln_b": jnp.zeros((cin,), jnp.float32),
                "w1": _kaiming(kg(), (kernel_size, cin, cm), kernel_size * cin,
                               jnp.bfloat16),
                "b1": jnp.zeros((cm,), jnp.float32),
                "w2": _kaiming(kg(), (cm, cin), cm, jnp.bfloat16),  # 1x1 conv
                "b2": jnp.zeros((cin,), jnp.float32),
            })
        res_blocks.append({"subs": subs})
    return {
        "kernel_size": kernel_size,
        "res_blocks": res_blocks,
        "ln_g": jnp.ones((cin,), jnp.float32),
        "ln_b": jnp.zeros((cin,), jnp.float32),
        "post_w": _kaiming(kg(), (post_kernel, cin, cout), post_kernel * cin,
                           jnp.bfloat16),
        "post_b": jnp.zeros((cout,), jnp.float32),
    }


def init_unet(kg, hidden, updown_rates, channel_multiples, mid_layers,
              kernel_size=3, skip_scale=1.0):
    down, up = [], []
    ch = hidden
    chs = [ch]
    for r, m in zip(updown_rates, channel_multiples):
        out_ch = int(ch * m)
        down.append({
            "rate": r,
            "conv": {"w": _kaiming(kg(), (kernel_size, ch, out_ch),
                                   kernel_size * ch, jnp.bfloat16),
                     "b": jnp.zeros((out_ch,), jnp.float32)},
            "cb": init_conv_blocks(kg, out_ch, out_ch, num_layers=1, layers_in_block=1),
        })
        ch = out_ch
        chs.append(ch)
    mid = init_conv_blocks(kg, ch, ch, num_layers=mid_layers, layers_in_block=1)
    for i in reversed(range(len(updown_rates))):
        r = updown_rates[i]
        out_ch = chs[i]
        up.append({
            "rate": r,
            "convt": {"w": _kaiming(kg(), (ch, r, out_ch), ch, jnp.bfloat16),
                      "b": jnp.zeros((out_ch,), jnp.float32)},
            "cb": init_conv_blocks(kg, out_ch, out_ch, num_layers=1, layers_in_block=1),
        })
        ch = out_ch
    return {"down": down, "mid": mid, "up": up, "skip_scale": skip_scale}


def init_tech_extractor(kg, cfg):
    H = cfg["hidden_size"]
    mel_bins = cfg["use_mel_bins"]
    tech_num = cfg["tech_num"]
    nh = cfg["tech_attn_num_head"]

    pitch_tbl = _kaiming(kg(), (300, H), H).at[0].set(0.0)   # padding_idx=0
    uv_tbl = _kaiming(kg(), (3, H), H).at[0].set(0.0)

    return {
        "mel_proj": {"w": _kaiming(kg(), (3, mel_bins, H), 3 * mel_bins, jnp.bfloat16),
                     "b": jnp.zeros((H,), jnp.float32)},
        "mel_encoder": init_conv_blocks(kg, H, H, num_layers=1, layers_in_block=2),
        "pitch_embed": pitch_tbl,
        "uv_embed": uv_tbl,
        "cond_encoder": init_conv_blocks(kg, H, H, num_layers=1, layers_in_block=1),
        "unet": init_unet(kg, H,
                          updown_rates=cfg["updown_rates"],
                          channel_multiples=cfg["channel_multiples"],
                          mid_layers=cfg["bkb_layers"]),
        # attention projection weights kept [nh, H] f32 (VPU path, no MXU)
        "attn_w_t": _kaiming(kg(), (nh, H), H),
        "attn_b": jnp.zeros((nh,), jnp.float32),
        "post": init_conv_blocks(kg, H, H, num_layers=1, layers_in_block=1),
        "out_w": _kaiming(kg(), (H, tech_num), H, jnp.bfloat16),
        "out_b": jnp.zeros((tech_num,), jnp.float32),
    }


# ----------------------------------------------------------------------------
# Demo
# ----------------------------------------------------------------------------

if __name__ == "__main__":
    cfg = {
        "hidden_size": 32,
        "use_mel_bins": 16,
        "dropout": 0.0,
        "use_f0": True,
        "tech_num": 6,
        "tech_threshold": 0.5,
        "tech_temperature": 1.0,
        "tech_attn_num_head": 1,
        "bkb_layers": 2,                 # hparams['bkb_layers'] (small for the demo)
        "updown_rates": [2, 2, 2],
        "channel_multiples": [1.125, 1.125, 1.125],
    }

    B, T = 2, 32                          # T divisible by prod(updown_rates) = 8

    kg = KeyGen(jax.random.PRNGKey(0))
    params = init_tech_extractor(kg, cfg)

    k1, k2, k3, k4 = jax.random.split(jax.random.PRNGKey(0), 4)
    mel = jax.random.normal(k1, (B, T, cfg["use_mel_bins"]), jnp.float32)
    pitch = jax.random.randint(k2, (B, T), 1, 300, dtype=jnp.int32)
    uv = jax.random.randint(k3, (B, T), 0, 3, dtype=jnp.int32)
    ph_bd = (jax.random.uniform(k4, (B, T)) < 0.2).astype(jnp.int32)

    # ph_length is data dependent (torch uses .item()); compute host-side.
    ph_length = int(np.max(np.sum(np.asarray(ph_bd), axis=1))) + 1

    ret = tech_extractor_forward(params, cfg, mel, ph_bd, pitch, uv, ph_length)
    jax.block_until_ready(ret)

    assert ret["tech_logits"].shape == (B, ph_length, cfg["tech_num"])
    assert ret["tech_pred"].shape == (B, ph_length, cfg["tech_num"])
    print("KERNEL_OK")
</pallas_src>

<mosaic_0001>
module attributes {stable_mosaic.version = 11 : i64} {
  func.func @kernel(%arg0: i32, %arg1: memref<1x32x16xf32, #tpu.memory_space<vmem>>, %arg2: memref<3x16x32xbf16, #tpu.memory_space<vmem>>, %arg3: memref<1x32xf32, #tpu.memory_space<vmem>>, %arg4: memref<1x32x32xf32, #tpu.memory_space<vmem>>) attributes {dimension_semantics = [#tpu.dimension_semantics<parallel>], iteration_bounds = array<i64: 2>, scalar_prefetch = 0 : i64, scratch_operands = 0 : i64, tpu.core_type = #tpu.core_type<tc>, window_params = [{transform_indices = @transform_0, window_bounds = array<i64: 1, 32, 16>}, {pipeline_mode = #tpu.pipeline_mode<synchronous>, transform_indices = @transform_1, window_bounds = array<i64: 3, 16, 32>}, {pipeline_mode = #tpu.pipeline_mode<synchronous>, transform_indices = @transform_2, window_bounds = array<i64: 1, 32>}, {transform_indices = @transform_3, window_bounds = array<i64: 1, 32, 32>}]} {
    %c0 = arith.constant 0 : index
    %c0_0 = arith.constant 0 : index
    %c0_1 = arith.constant 0 : index
    %0 = vector.load %arg1[%c0, %c0_0, %c0_1] : memref<1x32x16xf32, #tpu.memory_space<vmem>>, vector<1x32x16xf32>
    %1 = vector.shape_cast %0 : vector<1x32x16xf32> to vector<32x16xf32>
    %cst = arith.constant 0.000000e+00 : f32
    %2 = vector.broadcast %cst : f32 to vector<1x16xf32>
    %3 = vector.extract_strided_slice %1 {offsets = [0, 0], sizes = [31, 16], strides = [1, 1]} : vector<32x16xf32> to vector<31x16xf32>
    %4 = tpu.concatenate %2, %3 in 0 : vector<1x16xf32>, vector<31x16xf32> -> vector<32x16xf32>
    %5 = vector.extract_strided_slice %1 {offsets = [1, 0], sizes = [31, 16], strides = [1, 1]} : vector<32x16xf32> to vector<31x16xf32>
    %6 = tpu.concatenate %5, %2 in 0 : vector<31x16xf32>, vector<1x16xf32> -> vector<32x16xf32>
    %7 = arith.truncf %1 : vector<32x16xf32> to vector<32x16xbf16>
    %c1 = arith.constant 1 : index
    %c0_2 = arith.constant 0 : index
    %c0_3 = arith.constant 0 : index
    %8 = vector.load %arg2[%c1, %c0_2, %c0_3] : memref<3x16x32xbf16, #tpu.memory_space<vmem>>, vector<1x16x32xbf16>
    %9 = vector.shape_cast %8 : vector<1x16x32xbf16> to vector<16x32xbf16>
    %cst_4 = arith.constant dense<0.000000e+00> : vector<32x32xf32>
    %10 = tpu.matmul %7, %9, %cst_4 {dimension_numbers = #tpu.dot_dimension_numbers<[1], [0], [0], [1], [0, 0, 1, 1], [], []>} : vector<32x16xbf16>, vector<16x32xbf16>, vector<32x32xf32> -> vector<32x32xf32>
    %11 = arith.truncf %4 : vector<32x16xf32> to vector<32x16xbf16>
    %c0_5 = arith.constant 0 : index
    %c0_6 = arith.constant 0 : index
    %c0_7 = arith.constant 0 : index
    %12 = vector.load %arg2[%c0_5, %c0_6, %c0_7] : memref<3x16x32xbf16, #tpu.memory_space<vmem>>, vector<1x16x32xbf16>
    %13 = vector.shape_cast %12 : vector<1x16x32xbf16> to vector<16x32xbf16>
    %cst_8 = arith.constant dense<0.000000e+00> : vector<32x32xf32>
    %14 = tpu.matmul %11, %13, %cst_8 {dimension_numbers = #tpu.dot_dimension_numbers<[1], [0], [0], [1], [0, 0, 1, 1], [], []>} : vector<32x16xbf16>, vector<16x32xbf16>, vector<32x32xf32> -> vector<32x32xf32>
    %15 = arith.addf %10, %14 : vector<32x32xf32>
    %16 = arith.truncf %6 : vector<32x16xf32> to vector<32x16xbf16>
    %c2 = arith.constant 2 : index
    %c0_9 = arith.constant 0 : index
    %c0_10 = arith.constant 0 : index
    %17 = vector.load %arg2[%c2, %c0_9, %c0_10] : memref<3x16x32xbf16, #tpu.memory_space<vmem>>, vector<1x16x32xbf16>
    %18 = vector.shape_cast %17 : vector<1x16x32xbf16> to vector<16x32xbf16>
    %cst_11 = arith.constant dense<0.000000e+00> : vector<32x32xf32>
    %19 = tpu.matmul %16, %18, %cst_11 {dimension_numbers = #tpu.dot_dimension_numbers<[1], [0], [0], [1], [0, 0, 1, 1], [], []>} : vector<32x16xbf16>, vector<16x32xbf16>, vector<32x32xf32> -> vector<32x32xf32>
    %20 = arith.addf %15, %19 : vector<32x32xf32>
    %c0_12 = arith.constant 0 : index
    %c0_13 = arith.constant 0 : index
    %21 = vector.load %arg3[%c0_12, %c0_13] : memref<1x32xf32, #tpu.memory_space<vmem>>, vector<1x32xf32>
    %22 = vector.broadcast %21 : vector<1x32xf32> to vector<32x32xf32>
    %23 = arith.addf %20, %22 : vector<32x32xf32>
    %c0_14 = arith.constant 0 : index
    %c0_15 = arith.constant 0 : index
    %c0_16 = arith.constant 0 : index
    %24 = vector.load %arg4[%c0_14, %c0_15, %c0_16] : memref<1x32x32xf32, #tpu.memory_space<vmem>>, vector<1x32x32xf32>
    %25 = vector.shape_cast %24 : vector<1x32x32xf32> to vector<32x32xf32>
    %26 = vector.shape_cast %23 : vector<32x32xf32> to vector<1x32x32xf32>
    tpu.vector_store %arg4[%c0_14, %c0_15, %c0_16], %26 {strides = array<i32>} : memref<1x32x32xf32, #tpu.memory_space<vmem>>, vector<1x32x32xf32>,
    return
  }
  func.func @transform_0(%arg0: i32) -> (i32, i32, i32) {
    %c0_i32 = arith.constant 0 : i32
    %c0_i32_0 = arith.constant 0 : i32
    %c0_i32_1 = arith.constant 0 : i32
    return %arg0, %c0_i32, %c0_i32_0 : i32, i32, i32
  }
  func.func @transform_1(%arg0: i32) -> (i32, i32, i32) {
    %c0_i32 = arith.constant 0 : i32
    %c0_i32_0 = arith.constant 0 : i32
    %c0_i32_1 = arith.constant 0 : i32
    %c0_i32_2 = arith.constant 0 : i32
    return %c0_i32, %c0_i32_0, %c0_i32_1 : i32, i32, i32
  }
  func.func @transform_2(%arg0: i32) -> (i32, i32) {
    %c0_i32 = arith.constant 0 : i32
    %c0_i32_0 = arith.constant 0 : i32
    %c0_i32_1 = arith.constant 0 : i32
    return %c0_i32, %c0_i32_0 : i32, i32
  }
  func.func @transform_3(%arg0: i32) -> (i32, i32, i32) {
    %c0_i32 = arith.constant 0 : i32
    %c0_i32_0 = arith.constant 0 : i32
    %c0_i32_1 = arith.constant 0 : i32
    return %arg0, %c0_i32, %c0_i32_0 : i32, i32, i32
  }
}

</mosaic_0001>

<bundles_post_ra>
// kernel: tpu_custom_call.1
= control target key start
LH: loop header
LB: loop body
LE: loop exit
PB: predicated region body
PF: predicated region fallthrough
CT: control target
= control target key end

     0   :  { %8 = vsyncpa [#allocation3], 0  ;;  %s818_s0 = inlined_call_operand.vmem [shape: f32[2,32,16], index: 0, kind: input, shape index: {}]   ;;  %s819_s1 = inlined_call_operand.vmem [shape: bf16[3,16,32], index: 1, kind: input, shape index: {}]   ;;  %s820_s2 = inlined_call_operand.vmem [shape: f32[1,32], index: 2, kind: input, shape index: {}]   ;;  %s821_s3 = inlined_call_operand.hbm [shape: f32[2,32,32], index: 3, kind: output, shape index: {}]  }
   0x1   :  { %10 = vsyncpa [#allocation3 + $0x1], 0  ;;  %s682_s12 = smov 0   ;;  %s684_s13 = smov 0  }
   0x2   :  { %s686_s14 = smov 0   ;;  %s688_s15 = smov 0  }
   0x3 LB: > { %s703_s16 = sadd.s32 4294967295, %s657_s15   ;;  %s498_s17 = sadd.s32 4294967294, %s657_s15   ;;  %s657_s15 = sphi %s688_s15, %s827_s15   ;;  %s653_s14 = sphi %s686_s14, %s826_s14   ;;  %s649_s13 = sphi %s684_s13, %s825_s13   ;;  %s645_s12 = sphi %s682_s12, %s824_s12  }
   0x4   : > { %s707_s18 = sadd.s32 1, %s657_s15   ;;  %s91_s19 = sadd.s32 1, %s653_s14 }
   0x5   : > { %s88_s20 = ssub.s32 %s657_s15, %s707_s18  ;;  %p101_p0 = scmp.ne.s32.totalorder %s653_s14, %s649_s13 }
   0x6   : > { %p89_p1 = scmp.eq.s32.totalorder %s88_s20, 0  ;;  %p102_p2 = scmp.eq.s32.totalorder %s703_s16, 1 }
   0x7   : > { %p107_p3 = scmp.ne.s32.totalorder %s649_s13, %s645_s12  ;;  %p108_p4 = scmp.eq.s32.totalorder %s498_s17, 1 }
   0x8   : > { %s718_s21 = scalar_select %p89_p1, %s653_s14, %s91_s19  }
   0x9   : > { %p720_p5 = por %p102_p2, %p101_p0  ;;  %p724_p6 = por %p108_p4, %p107_p3 }
   0xa   : > { %p501_p7 = scmp.ge.s32.totalorder %s657_s15, 1  ;;  %p140_p8 = scmp.lt.s32.totalorder %s657_s15, 3 }
   0xc   : > { %p141_p9 = pnand %p501_p7, %p140_p8 }
   0xd   : > { %p164_p10 = scmp.lt.s32.totalorder (!%p141_p9), %s703_s16, 1  ;;  %s161_s8 = sand.u32 (!%p141_p9), 1, %s649_s13  }
   0xe   : > { %144 = sbr.rel (%p141_p9) target bundleno = 255 (0xff), region = 32  ;;  %s502_s9 = sshll.u32 (!%p141_p9), %s161_s8, 5 }
   0xf   : > { %s163_s17 = scalar_lea.vmem (!%p141_p9), [#allocation2], %s502_s9  ;;  %s525_s20 = sshll.u32 (!%p141_p9), %s703_s16, 9 }
  0x10   : > { %s436_s19 = sshll.u32 (!%p141_p9), %s163_s17, 4  ;;  %s770_s26 = scalar_lea.hbm (!%p141_p9), %s821_s3, %s525_s20  ;;  %s772_s19 = int_to_ptr.vmem [resolvable:$true] %s436_s19 }
  0x11   : > { %s597_s27 = scalar_lea.vmem (!%p141_p9), %s772_s19, 512 }
  0x12   : > { %p598_p11 = scmp.ne.s32.totalorder (!%p141_p9), %s772_s19, %s597_s27 }
  0x13   : > { %v594_v0 = vld [vmem:[%s819_s1] sm:$0xff]   ;;  %v595_v1 = vld [vmem:[%s819_s1 + $0x8] sm:$0xff]   ;;  %s165_s28 = scalar_select %p164_p10, %s703_s16, 1  ;;  %v596_v2 = vld [vmem:[%s819_s1 + $0x10] sm:$0xff]   ;;  %vm178_vm0 = vcmask 1040384   ;;  %vm219_vm1 = vcmask 130048  }
  0x14   : > { %535 = vmatprep.subr.bf16.mxu0 %v594_v0  ;;  %541 = vmatprep.subr.bf16.mxu1 %v595_v1  ;;  %vm191_vm2 = vcmask 1046528   ;;  %v518_v38 = vld [vmem:[%s820_s2] ss:$0 sm:$0xff]  ;;  %vm417_vm3 = vcmask 261120   ;;  %s778_s16 = scalar_lea.sflag [#allocation3], %s161_s8  ;;  %p599_p12 = pnand %p598_p11, %p720_p5 }
  0x15   : > { %536 = vmatpush3.bf16.msra.mxu0 %v594_v0  ;;  %542 = vmatpush3.bf16.msra.mxu1 %v595_v1  ;;  %s524_s4 = sshll.u32 %s165_s28, 5  ;;  %s659_s28 = smov [#allocation2]  }
  0x16   : > { %s168_s7 = scalar_lea.vmem %s818_s0, %s524_s4  ;;  %547 = vmatprep.subr.bf16.mxu0 %v596_v2  ;;  %p600_p13 = pneg %p599_p12 }
  0x17   : > { %v170_v3 = vld [vmem:[%s168_s7] sm:$0xff]  ;;  %v171_v4 = vld [vmem:[%s168_s7 + $0x8] sm:$0xff]  ;;  %v172_v5 = vld [vmem:[%s168_s7 + $0x10] sm:$0xff]  ;;  %s601_s29 = sshll.u32 %s659_s28, 4  ;;  %s602_s29 = int_to_ptr.vmem [resolvable:$false] %s601_s29 }
  0x18   : > { %v173_v6 = vld [vmem:[%s168_s7 + $0x18] sm:$0xff]  ;;  %v179_v7 = vrot.slane %v170_v3, 7  ;;  %v180_v8 = vrot.slane %v171_v4, 7  ;;  %v192_v9 = vrot.slane %v170_v3, 1  ;;  %v193_v10 = vrot.slane %v171_v4, 1  ;;  %s603_s30 = scalar_lea.vmem %s602_s29, 1024  ;;  %p604_p0 = scmp.lt.s32.totalorder %s772_s19, %s602_s29 }
  0x19   : > { %v204_v11 = vpack.c.bf16 %v171_v4, %v170_v3  ;;  %v182_v12 = vrot.slane %v172_v5, 7  ;;  %v184_v13 = vrot.slane %v173_v6, 7  ;;  %v205_v14 = vpack.c.bf16 %v173_v6, %v172_v5  ;;  %p605_p1 = scmp.lt.s32.totalorder %s603_s30, %s597_s27 }
  0x1a   : > { %v181_v15 = vsel %vm178_vm0, %v179_v7, %v180_v8  ;;  %v190_v16 = vsel %vm178_vm0, 0.0, %v179_v7  ;;  %v194_v17 = vsel %vm191_vm2, %v192_v9, %v193_v10  ;;  %v195_v18 = vrot.slane %v172_v5, 1 }
  0x1b   : > { %v209_v19 = vpack.c.bf16 %v181_v15, %v190_v16  ;;  %543 = vmatprep.mubr.msk.bf16.mxu1 %vm219_vm1, %v204_v11  ;;  %v183_v20 = vsel %vm178_vm0, %v180_v8, %v182_v12  ;;  %v185_v21 = vsel %vm178_vm0, %v182_v12, %v184_v13  ;;  %v197_v22 = vrot.slane %v173_v6, 1  ;;  %p606_p2 = por %p605_p1, %p604_p0 }
  0x1c   : > { %v210_v23 = vpack.c.bf16 %v185_v21, %v183_v20  ;;  %544 = vmatmul.mubr.msk.bf16.vlgmr.msra.gmra.mxu1 %vm219_vm1, %v205_v14  ;;  %v196_v24 = vsel %vm191_vm2, %v193_v10, %v195_v18 }
  0x1d   : > { %537 = vmatprep.mubr.msk.bf16.mxu0 %vm219_vm1, %v209_v19  ;;  %v336_v25 = vpack.c.bf16 %v196_v24, %v194_v17  ;;  %v198_v26 = vsel %vm191_vm2, %v195_v18, %v197_v22  ;;  %v203_v27 = vsel %vm191_vm2, %v197_v22, 0.0  ;;  %p607_p3 = pnand %p606_p2, %p600_p13 }
  0x1e   : > { %538 = vmatmul.mubr.msk.bf16.vlgmr.msra.gmra.mxu0 %vm219_vm1, %v210_v23  ;;  %v337_v28 = vpack.c.bf16 %v203_v27, %v198_v26 }
  0x1f   : > { %548 = vmatpush3.bf16.msra.mxu0 %v596_v2  ;;  %549 = vmatprep.mubr.msk.bf16.mxu0 %vm219_vm1, %v336_v25 }
  0x26   : > { %550 = vmatmul.mubr.msk.bf16.vlgmr.msra.gmra.mxu0 %vm219_vm1, %v337_v28 }
  0xdc   : > { %v545_v29 = vpop.f32.mrf.mxu1 }
  0xde   : > { %v539_v30 = vpop.f32.mrf.mxu0  ;;  %v321_v32 = vpop.f32.mrf.mxu1 }
  0xdf   : > { %v330_v36 = vadd.f32 %v545_v29, %v539_v30 }
  0xe0   : > { %v260_v31 = vpop.f32.mrf.mxu0  ;;  %v546_v34 = vpop.f32.mrf.mxu1 }
  0xe1   : > { %v322_v39 = vadd.f32 %v321_v32, %v260_v31 }
  0xe2   : > { %v540_v33 = vpop.f32.mrf.mxu0  ;;  %v324_v41 = vpop.f32.mrf.mxu1 }
  0xe3   : > { %v333_v43 = vadd.f32 %v546_v34, %v540_v33 }
  0xe4   : > { %v263_v35 = vpop.f32.mrf.mxu0 }
  0xe5   : > { %v325_v47 = vadd.f32 %v324_v41, %v263_v35 }
  0xe6   : > { %v551_v37 = vpop.f32.mrf.mxu0 }
  0xe7   : > { %v404_v40 = vadd.f32 %v551_v37, %v330_v36 }
  0xe8   : > { %v387_v42 = vpop.f32.mrf.mxu0 }
  0xe9   : > { %v415_v44 = vadd.f32 %v518_v38, %v404_v40  ;;  %v402_v45 = vadd.f32 %v387_v42, %v322_v39 }
  0xea   : > { %v552_v46 = vpop.f32.mrf.mxu0 }
  0xeb   : > { %420 = vst.msk [vmem:[%s163_s17 + $0x10] sm:$0xff] %vm417_vm3, %v415_v44  ;;  %v413_v48 = vadd.f32 %v518_v38, %v402_v45  ;;  %v405_v49 = vadd.f32 %v552_v46, %v333_v43 }
  0xec   : > { %v390_v50 = vpop.f32.mrf.mxu0 }
  0xed   : > { %418 = vst.msk [vmem:[%s163_s17] sm:$0xff] %vm417_vm3, %v413_v48  ;;  %v416_v51 = vadd.f32 %v518_v38, %v405_v49  ;;  %v403_v52 = vadd.f32 %v390_v50, %v325_v47 }
  0xef   : > { %421 = vst.msk [vmem:[%s163_s17 + $0x18] sm:$0xff] %vm417_vm3, %v416_v51  ;;  %v414_v53 = vadd.f32 %v518_v38, %v403_v52 }
  0xf1   : > { %419 = vst.msk [vmem:[%s163_s17 + $0x8] sm:$0xff] %vm417_vm3, %v414_v53 }
  0xf2   : > { %610 = shalt.err (!%p607_p3)
}
  0xf3   : > { %s611_s4 = scalar_lea.hbm %s770_s26, 512  ;;  %s615_s7 = scalar_lea.hbm %s821_s3, 1024 }
  0xf4   : > { %p612_p4 = scmp.ne.s32.totalorder %s770_s26, %s611_s4  ;;  %p616_p9 = scmp.lt.s32.totalorder %s770_s26, %s821_s3 }
  0xf5   : > { %p617_p10 = scmp.lt.s32.totalorder %s615_s7, %s611_s4 }
  0xf6   : > { %p613_p7 = pnand %p612_p4, %p720_p5 }
  0xf7   : > { %p618_p11 = por %p617_p10, %p616_p9 }
  0xf8   : > { %p614_p8 = pneg %p613_p7 }
  0xfa   : > { %p619_p12 = pnand %p618_p11, %p614_p8 }
  0xfc   : > { %622 = shalt.err (!%p619_p12)
}
  0xfd   : > { %s660_s10 = smov 128   ;;  %s661_s11 = smov 8  }
  0xfe   : > { %553 = dma.vmem_to_hbm [thread:$0]  (%p720_p5), %s772_s19, 512, %s770_s26, %s778_s16, %s660_s10, %s660_s10, %s661_s11  }
  0xff PF: > { %p559_p13 = scmp.ge.s32.totalorder %s657_s15, 2  ;;  %s451_s17 = sand.u32 1, %s645_s12  }
 0x100   : > { %s452_s20 = scalar_lea.sflag [#allocation3], %s451_s17 }
 0x101   : > { %p556_p0 = pnand %p559_p13, %p724_p6 }
 0x103   : > { %p557_p1 = pneg %p556_p0 }
 0x105   : > { %640 = dma.done.wait (%p557_p1), %s452_s20, 512  }
 0x106   : > { %642 = vsyncadd (%p557_p1), %s452_s20, 4294966784  ;;  %p13_p2 = scmp.ge.s32.totalorder %s707_s18, 4   ;;  %s824_s12 = smov %s649_s13 }
 0x107   : > { %s825_s13 = smov %s653_s14  ;;  %s826_s14 = smov %s718_s21 }
 0x108   : > { %s827_s15 = smov %s707_s18  ;;  %15 = sbr.rel (!%p13_p2) target bundleno = 3 (0x3), region = 69 }
 0x10d   :  { %457 = vsyncpa [#allocation3], 1 }
 0x10e   :  { %459 = vsyncpa [#allocation3 + $0x1], 1 }

</bundles_post_ra>
